<compile_context>
chip_gen: v7x
topology: tpu7x:2x2x1
jax: 0.10.0
libtpu: 0.0.40
codegen_flags: <defaults>
</compile_context>

<pallas_src>
import jax
import jax.numpy as jnp
from jax.experimental import pallas as pl
from jax.experimental.pallas import tpu as pltpu


# --------------------------------------------------------------------------- #
# Hardware-aware sizing helpers
# --------------------------------------------------------------------------- #
def _vmem_budget():
    """Returns (vmem_limit_bytes to request, byte budget for pipelined tiles)."""
    try:
        phys = int(getattr(pltpu.get_tpu_info(), "vmem_capacity_bytes", 64 << 20))
    except Exception:
        phys = 64 << 20                       # conservative: v7x per-TensorCore VMEM
    phys = max(phys, 32 << 20)
    # Request ~3/4 of physical as the scoped limit (v5e/v6e ~96 MiB, v7x ~48 MiB)
    # and let the double-buffered data tiles use ~2/3 of that, leaving headroom
    # for weights, compiler scratch and semaphores.
    limit = min((phys * 3) // 4, 96 << 20)
    budget = (limit * 2) // 3
    return int(limit), int(budget)


def _pick_row_tile(r, hw, itemsize, per_buffer_budget):
    """Row-tile for the fallback streaming kernels: multiple of 8, sized from the
    actual dtype so bf16 inputs get 2x the rows of f32 for the same bytes."""
    rows = per_buffer_budget // max(1, hw * itemsize)
    rows = max(8, min(2048, (rows // 8) * 8))
    return min(rows, r)


# --------------------------------------------------------------------------- #
# Kernels
# --------------------------------------------------------------------------- #
def _fused_channel_gate_kernel(x_ref, w0_ref, b0_ref, w1_ref, b1_ref, o_ref):
    """pool -> (Linear + folded eval-BN) -> ReLU -> Linear -> broadcast.

    x_ref : (TB, C, HW)   input slab
    w0_ref: (C, Ch)       first Linear weight, transposed, BN scale folded in
    b0_ref: (1, Ch)       first Linear bias, BN folded in
    w1_ref: (Ch, C)       second Linear weight, transposed
    b1_ref: (1, C)        second Linear bias
    o_ref : (TB, C, HW)   gate broadcast over the spatial axis
    """
    hw = x_ref.shape[-1]
    # Global average pool: accumulate in f32 without materialising an upcast copy.
    pooled = jnp.sum(x_ref[...], axis=-1, dtype=jnp.float32) * (1.0 / hw)   # (TB, C)

    z = jnp.dot(pooled, w0_ref[...],
                preferred_element_type=jnp.float32,
                precision=jax.lax.Precision.HIGHEST) + b0_ref[...]          # (TB, Ch)
    z = jnp.maximum(z, 0.0)                                                 # ReLU

    g = jnp.dot(z, w1_ref[...],
                preferred_element_type=jnp.float32,
                precision=jax.lax.Precision.HIGHEST) + b1_ref[...]          # (TB, C)

    o_ref[...] = jnp.broadcast_to(g[:, :, None], o_ref.shape).astype(o_ref.dtype)


def _pool_kernel(x_ref, o_ref):
    """Fallback: global spatial mean per row.  (TR, HW) -> (TR, 1), f32 accumulate."""
    inv_hw = 1.0 / x_ref.shape[-1]
    s = jnp.sum(x_ref[...], axis=-1, dtype=jnp.float32, keepdims=True)
    o_ref[...] = (s * inv_hw).astype(o_ref.dtype)


def _gate_mlp_kernel(p_ref, w0_ref, b0_ref, w1_ref, b1_ref, o_ref):
    """Fallback: bottleneck MLP on the MXU.  p:(B,C) w0:(C,Ch) w1:(Ch,C) -> (B,C)."""
    z = jnp.dot(p_ref[...], w0_ref[...],
                preferred_element_type=jnp.float32,
                precision=jax.lax.Precision.HIGHEST) + b0_ref[...]
    z = jnp.maximum(z, 0.0)
    g = jnp.dot(z, w1_ref[...],
                preferred_element_type=jnp.float32,
                precision=jax.lax.Precision.HIGHEST) + b1_ref[...]
    o_ref[...] = g.astype(o_ref.dtype)


def _expand_kernel(g_ref, o_ref):
    """Fallback: broadcast per-row gate across the spatial (lane) axis."""
    o_ref[...] = jnp.broadcast_to(g_ref[...], o_ref.shape).astype(o_ref.dtype)


# --------------------------------------------------------------------------- #
# Wrapper
# --------------------------------------------------------------------------- #
def channel_gate(x, fc0_w, fc0_b, bn_gamma, bn_beta, bn_mean, bn_var,
                 fc1_w, fc1_b, eps=1e-5):
    """ChannelGate forward.

    x      : (B, C, H, W)  (H == W, as the module requires)
    fc0_w  : (C//r, C)   nn.Linear weight      fc0_b : (C//r,)
    bn_*   : (C//r,)     BatchNorm1d params / running stats (eval mode)
    fc1_w  : (C, C//r)   nn.Linear weight      fc1_b : (C,)
    returns: (B, C, H, W) — the gate expanded to x's shape (no sigmoid / no x*g,
             exactly as ChannelGate.forward).
    """
    b, c, h, w = x.shape
    assert h == w, "ChannelGate's avg_pool2d(kernel=H, stride=H) assumes H == W"
    hw = h * w
    ch = fc0_w.shape[0]

    # ---- fold eval-mode BatchNorm into the first Linear; pre-transpose for MXU ----
    # TODO(synk): training-mode BatchNorm1d (batch statistics) not implemented;
    # eval-mode running-stat normalization is folded into fc0 instead.
    s = bn_gamma / jnp.sqrt(bn_var + eps)                      # (Ch,)
    w0_eff = (fc0_w * s[:, None]).T                            # (C, Ch)
    b0_eff = (s * (fc0_b - bn_mean) + bn_beta).reshape(1, ch)  # (1, Ch)
    w1_t = fc1_w.T                                             # (Ch, C)
    b1_2d = fc1_b.reshape(1, c)                                # (1, C)

    vmem_limit, tile_budget = _vmem_budget()
    cparams_grid = pltpu.CompilerParams(dimension_semantics=("parallel",),
                                        vmem_limit_bytes=vmem_limit)

    in_bpe = x.dtype.itemsize
    out_bpe = in_bpe
    weight_bytes = (c * ch * 2 + ch + c) * 4
    slab_bytes = c * hw * (in_bpe + out_bpe)     # one batch element: input + output

    # ----------------------------- fused path --------------------------------- #
    if 2 * slab_bytes <= tile_budget:
        tb = max(1, tile_budget // (2 * slab_bytes))   # double-buffered in+out tiles
        if b >= 2:
            tb = min(tb, pl.cdiv(b, 2))                # >= 2 grid steps (v7x dual-TC)
        tb = min(tb, b)
        x3 = x.reshape(b, c, hw)
        grid = (pl.cdiv(b, tb),)

        flops = b * c * hw + 4 * b * c * ch + 2 * b * c
        bytes_accessed = 2 * b * c * hw * in_bpe + weight_bytes

        out3 = pl.pallas_call(
            _fused_channel_gate_kernel,
            out_shape=jax.ShapeDtypeStruct((b, c, hw), x.dtype),
            grid=grid,
            in_specs=[
                pl.BlockSpec((tb, c, hw), lambda i: (i, 0, 0)),
                pl.BlockSpec((c, ch), lambda i: (0, 0)),
                pl.BlockSpec((1, ch), lambda i: (0, 0)),
                pl.BlockSpec((ch, c), lambda i: (0, 0)),
                pl.BlockSpec((1, c), lambda i: (0, 0)),
            ],
            out_specs=pl.BlockSpec((tb, c, hw), lambda i: (i, 0, 0)),
            compiler_params=cparams_grid,
            cost_estimate=pl.CostEstimate(flops=int(flops), transcendentals=0,
                                          bytes_accessed=int(bytes_accessed)),
        )(x3, w0_eff, b0_eff, w1_t, b1_2d)
        return out3.reshape(b, c, h, w)

    # --------------------- fallback: three streaming kernels ------------------ #
    r = b * c
    x2 = x.reshape(r, hw)
    tr = _pick_row_tile(r, hw, in_bpe, tile_budget // 2)
    grid = (pl.cdiv(r, tr),)

    pooled = pl.pallas_call(
        _pool_kernel,
        out_shape=jax.ShapeDtypeStruct((r, 1), jnp.float32),
        grid=grid,
        in_specs=[pl.BlockSpec((tr, hw), lambda i: (i, 0))],
        out_specs=pl.BlockSpec((tr, 1), lambda i: (i, 0)),
        compiler_params=cparams_grid,
        cost_estimate=pl.CostEstimate(flops=int(r * hw), transcendentals=0,
                                      bytes_accessed=int(r * hw * in_bpe + r * 4)),
    )(x2)

    gate = pl.pallas_call(
        _gate_mlp_kernel,
        out_shape=jax.ShapeDtypeStruct((b, c), jnp.float32),
        compiler_params=pltpu.CompilerParams(vmem_limit_bytes=vmem_limit),
        cost_estimate=pl.CostEstimate(flops=int(4 * b * c * ch + 2 * b * c),
                                      transcendentals=0,
                                      bytes_accessed=int(2 * b * c * 4 + weight_bytes)),
    )(pooled.reshape(b, c), w0_eff, b0_eff, w1_t, b1_2d)

    out2 = pl.pallas_call(
        _expand_kernel,
        out_shape=jax.ShapeDtypeStruct((r, hw), x.dtype),
        grid=grid,
        in_specs=[pl.BlockSpec((tr, 1), lambda i: (i, 0))],
        out_specs=pl.BlockSpec((tr, hw), lambda i: (i, 0)),
        compiler_params=cparams_grid,
        cost_estimate=pl.CostEstimate(flops=0, transcendentals=0,
                                      bytes_accessed=int(r * hw * out_bpe + r * 4)),
    )(gate.reshape(r, 1))

    return out2.reshape(b, c, h, w)


# --------------------------------------------------------------------------- #
# Pure-JAX reference of the PyTorch forward (eval-mode BN)
# --------------------------------------------------------------------------- #
def _reference(x, fc0_w, fc0_b, bn_gamma, bn_beta, bn_mean, bn_var,
               fc1_w, fc1_b, eps=1e-5):
    hp = jax.lax.Precision.HIGHEST
    pooled = x.mean(axis=(2, 3))                               # (B, C)
    z = jnp.dot(pooled, fc0_w.T, precision=hp) + fc0_b         # (B, Ch)
    z = (z - bn_mean) / jnp.sqrt(bn_var + eps) * bn_gamma + bn_beta
    z = jnp.maximum(z, 0.0)
    g = jnp.dot(z, fc1_w.T, precision=hp) + fc1_b              # (B, C)
    return jnp.broadcast_to(g[:, :, None, None], x.shape)


if __name__ == "__main__":
    key = jax.random.PRNGKey(0)
    k_x, k_w0, k_b0, k_w1, k_b1 = jax.random.split(key, 5)

    # Small shapes consistent with the module: reduction_ratio=16 requires C >= 16.
    B, C, H, W = 2, 32, 16, 16
    reduction_ratio = 16
    hidden = C // reduction_ratio                              # = 2

    x = jax.random.normal(k_x, (B, C, H, W), dtype=jnp.float32)

    # Deterministic synthetic parameters (no checkpoint loading).
    fc0_w = jax.random.normal(k_w0, (hidden, C), jnp.float32) / jnp.sqrt(C)
    fc0_b = jax.random.normal(k_b0, (hidden,), jnp.float32) * 0.1
    fc1_w = jax.random.normal(k_w1, (C, hidden), jnp.float32) / jnp.sqrt(hidden)
    fc1_b = jax.random.normal(k_b1, (C,), jnp.float32) * 0.1
    bn_gamma = jnp.ones((hidden,), jnp.float32)
    bn_beta = jnp.zeros((hidden,), jnp.float32)
    bn_mean = jnp.zeros((hidden,), jnp.float32)   # running_mean at init
    bn_var = jnp.ones((hidden,), jnp.float32)     # running_var at init

    out = channel_gate(x, fc0_w, fc0_b, bn_gamma, bn_beta, bn_mean, bn_var,
                       fc1_w, fc1_b)
    out = jax.block_until_ready(out)

    ref = _reference(x, fc0_w, fc0_b, bn_gamma, bn_beta, bn_mean, bn_var,
                     fc1_w, fc1_b)
    assert out.shape == (B, C, H, W)
    # Tolerance accounts for the MXU multi-pass f32 matmul path (HIGHEST precision
    # requested); structural errors would be orders of magnitude larger.
    assert jnp.allclose(out, ref, atol=1e-3, rtol=1e-3), \
        f"max abs diff = {jnp.max(jnp.abs(out - ref))}"

    print("KERNEL_OK")
</pallas_src>

<mosaic_0001>
module attributes {stable_mosaic.version = 11 : i64} {
  func.func @_fused_channel_gate_kernel(%arg0: i32, %arg1: memref<1x32x256xf32, #tpu.memory_space<vmem>>, %arg2: memref<32x2xf32, #tpu.memory_space<vmem>>, %arg3: memref<1x2xf32, #tpu.memory_space<vmem>>, %arg4: memref<2x32xf32, #tpu.memory_space<vmem>>, %arg5: memref<1x32xf32, #tpu.memory_space<vmem>>, %arg6: memref<1x32x256xf32, #tpu.memory_space<vmem>>) attributes {dimension_semantics = [#tpu.dimension_semantics<parallel>], iteration_bounds = array<i64: 2>, scalar_prefetch = 0 : i64, scratch_operands = 0 : i64, tpu.core_type = #tpu.core_type<tc>, window_params = [{transform_indices = @transform_0, window_bounds = array<i64: 1, 32, 256>}, {pipeline_mode = #tpu.pipeline_mode<synchronous>, transform_indices = @transform_1, window_bounds = array<i64: 32, 2>}, {pipeline_mode = #tpu.pipeline_mode<synchronous>, transform_indices = @transform_2, window_bounds = array<i64: 1, 2>}, {pipeline_mode = #tpu.pipeline_mode<synchronous>, transform_indices = @transform_3, window_bounds = array<i64: 2, 32>}, {pipeline_mode = #tpu.pipeline_mode<synchronous>, transform_indices = @transform_4, window_bounds = array<i64: 1, 32>}, {transform_indices = @transform_5, window_bounds = array<i64: 1, 32, 256>}]} {
    %c0 = arith.constant 0 : index
    %c0_0 = arith.constant 0 : index
    %c0_1 = arith.constant 0 : index
    %0 = vector.load %arg1[%c0, %c0_0, %c0_1] : memref<1x32x256xf32, #tpu.memory_space<vmem>>, vector<1x32x256xf32>
    %cst = arith.constant dense<0.000000e+00> : vector<1x32xf32>
    %1 = vector.multi_reduction <add>, %0, %cst [2] : vector<1x32x256xf32> to vector<1x32xf32>
    %cst_2 = arith.constant 3.906250e-03 : f32
    %2 = vector.broadcast %cst_2 : f32 to vector<1x32xf32>
    %3 = arith.mulf %1, %2 : vector<1x32xf32>
    %c0_3 = arith.constant 0 : index
    %c0_4 = arith.constant 0 : index
    %4 = vector.load %arg2[%c0_3, %c0_4] : memref<32x2xf32, #tpu.memory_space<vmem>>, vector<32x2xf32>
    %cst_5 = arith.constant dense<0.000000e+00> : vector<1x2xf32>
    %5 = tpu.matmul %3, %4, %cst_5 {dimension_numbers = #tpu.dot_dimension_numbers<[1], [0], [0], [1], [0, 0, 1, 1], [], []>, precision = #tpu.contract_precision<fp32>} : vector<1x32xf32>, vector<32x2xf32>, vector<1x2xf32> -> vector<1x2xf32>
    %c0_6 = arith.constant 0 : index
    %c0_7 = arith.constant 0 : index
    %6 = vector.load %arg3[%c0_6, %c0_7] : memref<1x2xf32, #tpu.memory_space<vmem>>, vector<1x2xf32>
    %7 = arith.addf %5, %6 : vector<1x2xf32>
    %cst_8 = arith.constant 0.000000e+00 : f32
    %8 = vector.broadcast %cst_8 : f32 to vector<1x2xf32>
    %9 = arith.maximumf %7, %8 : vector<1x2xf32>
    %c0_9 = arith.constant 0 : index
    %c0_10 = arith.constant 0 : index
    %10 = vector.load %arg4[%c0_9, %c0_10] : memref<2x32xf32, #tpu.memory_space<vmem>>, vector<2x32xf32>
    %cst_11 = arith.constant dense<0.000000e+00> : vector<1x32xf32>
    %11 = tpu.matmul %9, %10, %cst_11 {dimension_numbers = #tpu.dot_dimension_numbers<[1], [0], [0], [1], [0, 0, 1, 1], [], []>, precision = #tpu.contract_precision<fp32>} : vector<1x2xf32>, vector<2x32xf32>, vector<1x32xf32> -> vector<1x32xf32>
    %c0_12 = arith.constant 0 : index
    %c0_13 = arith.constant 0 : index
    %12 = vector.load %arg5[%c0_12, %c0_13] : memref<1x32xf32, #tpu.memory_space<vmem>>, vector<1x32xf32>
    %13 = arith.addf %11, %12 : vector<1x32xf32>
    %14 = vector.shape_cast %13 : vector<1x32xf32> to vector<1x32x1xf32>
    %15 = vector.shape_cast %14 : vector<1x32x1xf32> to vector<1x32x1xf32>
    %16 = vector.broadcast %15 : vector<1x32x1xf32> to vector<1x32x256xf32>
    %c0_14 = arith.constant 0 : index
    %c0_15 = arith.constant 0 : index
    %c0_16 = arith.constant 0 : index
    %17 = vector.load %arg6[%c0_14, %c0_15, %c0_16] : memref<1x32x256xf32, #tpu.memory_space<vmem>>, vector<1x32x256xf32>
    tpu.vector_store %arg6[%c0_14, %c0_15, %c0_16], %16 {strides = array<i32>} : memref<1x32x256xf32, #tpu.memory_space<vmem>>, vector<1x32x256xf32>,
    return
  }
  func.func @transform_0(%arg0: i32) -> (i32, i32, i32) {
    %c0_i32 = arith.constant 0 : i32
    %c0_i32_0 = arith.constant 0 : i32
    %c0_i32_1 = arith.constant 0 : i32
    return %arg0, %c0_i32, %c0_i32_0 : i32, i32, i32
  }
  func.func @transform_1(%arg0: i32) -> (i32, i32) {
    %c0_i32 = arith.constant 0 : i32
    %c0_i32_0 = arith.constant 0 : i32
    %c0_i32_1 = arith.constant 0 : i32
    return %c0_i32, %c0_i32_0 : i32, i32
  }
  func.func @transform_2(%arg0: i32) -> (i32, i32) {
    %c0_i32 = arith.constant 0 : i32
    %c0_i32_0 = arith.constant 0 : i32
    %c0_i32_1 = arith.constant 0 : i32
    return %c0_i32, %c0_i32_0 : i32, i32
  }
  func.func @transform_3(%arg0: i32) -> (i32, i32) {
    %c0_i32 = arith.constant 0 : i32
    %c0_i32_0 = arith.constant 0 : i32
    %c0_i32_1 = arith.constant 0 : i32
    return %c0_i32, %c0_i32_0 : i32, i32
  }
  func.func @transform_4(%arg0: i32) -> (i32, i32) {
    %c0_i32 = arith.constant 0 : i32
    %c0_i32_0 = arith.constant 0 : i32
    %c0_i32_1 = arith.constant 0 : i32
    return %c0_i32, %c0_i32_0 : i32, i32
  }
  func.func @transform_5(%arg0: i32) -> (i32, i32, i32) {
    %c0_i32 = arith.constant 0 : i32
    %c0_i32_0 = arith.constant 0 : i32
    %c0_i32_1 = arith.constant 0 : i32
    return %arg0, %c0_i32, %c0_i32_0 : i32, i32, i32
  }
}

</mosaic_0001>

<bundles_post_ra>
// kernel: tpu_custom_call.1
= control target key start
LH: loop header
LB: loop body
LE: loop exit
PB: predicated region body
PF: predicated region fallthrough
CT: control target
= control target key end

     0   :  { %10 = vsyncpa [#allocation3], 0  ;;  %s2029_s0 = inlined_call_operand.hbm [shape: f32[2,32,256], index: 0, kind: input, shape index: {}]   ;;  %s2030_s1 = inlined_call_operand.vmem [shape: f32[32,2], index: 1, kind: input, shape index: {}]   ;;  %s2031_s2 = inlined_call_operand.vmem [shape: f32[1,2], index: 2, kind: input, shape index: {}]   ;;  %s2032_s3 = inlined_call_operand.vmem [shape: f32[2,32], index: 3, kind: input, shape index: {}]   ;;  %s2033_s4 = inlined_call_operand.vmem [shape: f32[1,32], index: 4, kind: input, shape index: {}]   ;;  %s2034_s5 = inlined_call_operand.hbm [shape: f32[2,32,256], index: 5, kind: output, shape index: {}]  }
   0x1   :  { %12 = vsyncpa [#allocation3 + $0x1], 0 }
   0x2   :  { %13 = vsyncpa [#allocation4], 0 }
   0x3   :  { %15 = vsyncpa [#allocation4 + $0x1], 0  ;;  %s1763_s18 = smov 0   ;;  %s1765_s19 = smov 0  }
   0x4   :  { %s1767_s20 = smov 0   ;;  %s1769_s21 = smov 0  }
   0x5 LB: > { %s1784_s22 = sadd.s32 4294967295, %s1722_s21   ;;  %s1362_s23 = sadd.s32 4294967294, %s1722_s21   ;;  %s1722_s21 = sphi %s1769_s21, %s2047_s21   ;;  %s1718_s20 = sphi %s1767_s20, %s2046_s20   ;;  %s1714_s19 = sphi %s1765_s19, %s2045_s19   ;;  %s1710_s18 = sphi %s1763_s18, %s2044_s18  }
   0x6   : > { %s1788_s24 = sadd.s32 1, %s1722_s21   ;;  %s28_s25 = sadd.s32 1, %s1718_s20 }
   0x7   : > { %s25_s26 = ssub.s32 %s1722_s21, %s1788_s24  ;;  %p35_p0 = scmp.ne.s32.totalorder %s1718_s20, %s1714_s19 }
   0x8   : > { %p26_p1 = scmp.eq.s32.totalorder %s25_s26, 0  ;;  %p36_p2 = scmp.eq.s32.totalorder %s1722_s21, 0 }
   0x9   : > { %p41_p3 = scmp.ne.s32.totalorder %s1714_s19, %s1710_s18  ;;  %p42_p4 = scmp.eq.s32.totalorder %s1784_s22, 0 }
   0xa   : > { %s1800_s27 = scalar_select %p26_p1, %s1718_s20, %s28_s25  }
   0xb   : > { %p1802_p5 = por %p36_p2, %p35_p0  ;;  %p1806_p6 = por %p42_p4, %p41_p3 }
   0xc   : > { %p149_p7 = scmp.eq.s32.totalorder %s1784_s22, 1  ;;  %p155_p8 = scmp.eq.s32.totalorder %s1362_s23, 1 }
   0xd   : > { %p1585_p10 = scmp.lt.s32.totalorder %s1722_s21, 2  ;;  %s187_s7 = sand.u32 1, %s1718_s20  }
   0xe   : > { %p1813_p11 = por %p149_p7, %p35_p0  ;;  %p1817_p12 = por %p155_p8, %p41_p3 }
   0xf   : > { %s1376_s8 = sshll.u32 %s1722_s21, 10  ;;  %s1365_s9 = sshll.u32 %s187_s7, 6 }
  0x10   : > { %s2038_s30 = scalar_select %p1813_p11, 1, 0 }
  0x11   : > { %s2039_s6 = scalar_select %p1817_p12, 1, 0 }
  0x12   : > { %s1826_s12 = scalar_lea.hbm %s2029_s0, %s1376_s8  ;;  %s191_s13 = scalar_lea.vmem [#allocation2], %s1365_s9 }
  0x13   : > { %s198_s14 = sshll.u32 %s191_s13, 4  ;;  %p1830_p13 = pnand %p1585_p10, %p1802_p5  ;;  %s1834_s14 = int_to_ptr.vmem [resolvable:$true] %s198_s14 }
  0x14   : > { %s1836_s16 = scalar_lea.sflag [#allocation3], %s187_s7  ;;  %s1626_s17 = scalar_lea.hbm %s1826_s12, 1024 }
  0x15   : > { %p1627_p0 = scmp.ne.s32.totalorder %s1826_s12, %s1626_s17  ;;  %p1628_p1 = pneg %p1830_p13 }
  0x16   : > { %s1631_s26 = scalar_lea.hbm %s2029_s0, 2048  ;;  %p1632_p4 = scmp.lt.u32.totalorder %s1826_s12, %s2029_s0 }
  0x17   : > { %p1629_p2 = pnand %p1628_p1, %p1627_p0  ;;  %p1633_p5 = scmp.lt.u32.totalorder %s1631_s26, %s1626_s17 }
  0x18   : > { %p1635_p8 = scmp.lt.u32.totalorder %s1626_s17, %s1826_s12 }
  0x19   : > { %p1630_p3 = pneg %p1629_p2  ;;  %p1634_p7 = por %p1633_p5, %p1632_p4 }
  0x1b   : > { %p1636_p10 = por %p1635_p8, %p1634_p7 }
  0x1d   : > { %p1637_p9 = pnand %p1636_p10, %p1630_p3 }
  0x1f   : > { %1640 = shalt.err (!%p1637_p9)
}
  0x20   : > { %s1641_s7 = scalar_lea.vmem %s1834_s14, 1024  ;;  %s1724_s9 = smov [#allocation2]  }
  0x21   : > { %p1642_p0 = scmp.ne.s32.totalorder %s1834_s14, %s1641_s7  ;;  %s1646_s10 = sshll.u32 %s1724_s9, 4  ;;  %s1647_s10 = int_to_ptr.vmem [resolvable:$false] %s1646_s10 }
  0x22   : > { %s1648_s11 = scalar_lea.vmem %s1647_s10, 2048  ;;  %p1649_p11 = scmp.lt.s32.totalorder %s1834_s14, %s1647_s10 }
  0x23   : > { %p1644_p2 = pnand %p1642_p0, %p1628_p1  ;;  %p1650_p4 = scmp.lt.s32.totalorder %s1648_s11, %s1641_s7 }
  0x25   : > { %p1645_p12 = pneg %p1644_p2  ;;  %p1651_p5 = por %p1650_p4, %p1649_p11 }
  0x27   : > { %p1652_p7 = pnand %p1651_p5, %p1645_p12 }
  0x29   : > { %1655 = shalt.err (!%p1652_p7)
}
  0x2a   : > { %s1725_s13 = smov 256   ;;  %s1726_s17 = smov 16  }
  0x2b   : > { %1580 = dma.hbm_to_vmem [thread:$0]  (!%p1830_p13), %s1826_s12, 1024, %s1834_s14, %s1836_s16, %s1725_s13, %s1725_s13, %s1726_s17  }
  0x2c   : > { %p1368_p9 = scmp.ge.s32.totalorder %s1722_s21, 1  ;;  %p206_p1 = scmp.lt.s32.totalorder %s1722_s21, 3 }
  0x2e   : > { %p207_p3 = pnand %p1368_p9, %p206_p1 }
  0x2f   : > { %s1867_s23 = sand.u32 (!%p207_p3), 1, %s1714_s19  }
  0x30   : > { %210 = sbr.rel (%p207_p3) target bundleno = 868 (0x364), region = 40  ;;  %s1369_s25 = sshll.u32 (!%p207_p3), %s1867_s23, 6 }
  0x31   : > { %s213_s26 = scalar_lea.sflag (!%p207_p3), [#allocation3], %s1867_s23  ;;  %s216_s28 = scalar_lea.vmem (!%p207_p3), [#allocation2], %s1369_s25 }
  0x37   : > { %1701 = dma.done.wait (%p1806_p6), %s213_s26, 1024  }
  0x38   : > { %1703 = vsyncadd (%p1806_p6), %s213_s26, 4294966272  ;;  %v243_v0 = vld [vmem:[%s216_s28] sm:$0xff]  ;;  %v244_v1 = vld [vmem:[%s216_s28 + $0x8] sm:$0xff]  ;;  %v1727_v34 = vmov 0.0|0.0   ;;  %vm1728_vm0 = vmmov 0   ;;  %v1729_v39 = vmov 0.0   ;;  %v276_v46 = vlaneseq }
  0x39   : > { %v247_v2 = vld [vmem:[%s216_s28 + $0x20] sm:$0xff]  ;;  %v251_v3 = vadd.f32 %v244_v1, %v243_v0  ;;  %v248_v4 = vld [vmem:[%s216_s28 + $0x28] sm:$0xff]  ;;  %v245_v5 = vld [vmem:[%s216_s28 + $0x10] sm:$0xff]  ;;  %1522 = vmatprep.subr.bf16.mxu0 %v1727_v34  ;;  %1516 = vmatprep.subr.bf16.mxu1 %v1727_v34  ;;  %vm287_vm1 = vcmask 130112   ;;  %vm294_vm2 = vcmask 195712   ;;  %vm301_vm3 = vcmask 261312  }
  0x3a   : > { %v246_v6 = vld [vmem:[%s216_s28 + $0x18] sm:$0xff]  ;;  %v257_v7 = vadd.f32 %v248_v4, %v247_v2  ;;  %v249_v8 = vld [vmem:[%s216_s28 + $0x30] sm:$0xff]  ;;  %v267_v12 = vld [vmem:[%s2030_s1] sm:$0xff]  ;;  %1439 = vmatprep.mubr.msk.f32.mxu0 %vm1728_vm0, %v1729_v39  ;;  %1428 = vmatprep.mubr.msk.f32.mxu1 %vm1728_vm0, %v1729_v39  ;;  %v277_v47 = vand.u32 127, %v276_v46  ;;  %v1925_v48 = vshrl.u32 %v276_v46, 7  ;;  %vm303_vm4 = vcmask 261120  }
  0x3b   : > { %v250_v9 = vld [vmem:[%s216_s28 + $0x38] sm:$0xff]  ;;  %252 = vadd.xlane.f32.xlu0 %v251_v3  ;;  %v254_v10 = vadd.f32 %v246_v6, %v245_v5  ;;  %v268_v13 = vld [vmem:[%s2030_s1 + $0x8] sm:$0xff]  ;;  %v307_v14 = vand.u32 4294901760, %v267_v12  ;;  %v269_v18 = vld [vmem:[%s2030_s1 + $0x10] sm:$0xff]  ;;  %vm798_vm5 = vcmask 1041408   ;;  %vm794_vm6 = vcmask 15360  }
  0x3c   : > { %258 = vadd.xlane.f32.xlu1 %v257_v7  ;;  %v260_v11 = vadd.f32 %v250_v9, %v249_v8  ;;  %v310_v15 = vand.u32 4294901760, %v268_v13  ;;  %v270_v19 = vld [vmem:[%s2030_s1 + $0x18] sm:$0xff]  ;;  %v313_v22 = vand.u32 4294901760, %v269_v18  ;;  %v282_v49 = vadd.s32 4294967288, %v277_v47  ;;  %s242_s12 = scalar_lea.vmem [#allocation5], %s1369_s25  ;;  %s1377_s29 = sshll.u32 %s1784_s22, 10 }
  0x3d   : > { %v1883_v16 = vsub.f32 %v267_v12, %v307_v14  ;;  %v316_v23 = vand.u32 4294901760, %v270_v19  ;;  %v289_v51 = vadd.s32 4294967280, %v277_v47  ;;  %v296_v52 = vadd.s32 4294967272, %v277_v47  ;;  %s1289_s14 = sshll.u32 %s242_s12, 4  ;;  %s1985_s8 = scalar_lea.hbm %s2034_s5, %s1377_s29  ;;  %s1980_s14 = int_to_ptr.vmem [resolvable:$true] %s1289_s14 }
  0x3e   : > { %v1885_v17 = vsub.f32 %v268_v13, %v310_v15  ;;  %v1897_v26 = vsub.f32 %v269_v18, %v313_v22  ;;  %v1913_v41 = vpack.c.bf16 %v310_v15, %v307_v14  ;;  %v280_v54 = vsub.s32 %v277_v47, %v1925_v48  ;;  %v792_v13 = vld [vmem:[%s2032_s3] sm:$0x3]  ;;  %s1276_s25 = scalar_lea.sflag [#allocation4], %s1867_s23  ;;  %s1656_s7 = scalar_lea.vmem %s1980_s14, 1024 }
  0x3f   : > { %255 = vadd.xlane.f32.xlu0 %v254_v10  ;;  %v388_v20 = vand.u32 4294901760, %v1883_v16  ;;  %v1899_v27 = vsub.f32 %v270_v19, %v316_v23  ;;  %v1921_v43 = vpack.c.bf16 %v316_v23, %v313_v22  ;;  %v285_v56 = vsub.s32 %v282_v49, %v1925_v48  ;;  %v271_v18 = vld [vmem:[%s2031_s2] sm:$0x1]  ;;  %p1657_p6 = scmp.ne.s32.totalorder %s1980_s14, %s1656_s7  ;;  %p2041_p11 = scmp.ne.s32.totalorder %s2038_s30, 0 }
  0x40   : > { %261 = vadd.xlane.f32.xlu1 %v260_v11  ;;  %v395_v21 = vand.u32 4294901760, %v1885_v17  ;;  %v402_v30 = vand.u32 4294901760, %v1897_v26  ;;  %v1529_v40 = vpack.c.bf16 %v1885_v17, %v1883_v16  ;;  %1518 = vmatpush3.bf16.msra.mxu1 %v1913_v41  ;;  %v292_v57 = vsub.s32 %v289_v51, %v1925_v48  ;;  %s1730_s22 = smov [#allocation5]  }
  0x41   : > { %v389_v24 = vsub.f32 %v1883_v16, %v388_v20  ;;  %v409_v31 = vand.u32 4294901760, %v1899_v27  ;;  %1519 = vmatprep.subr.bf16.mxu1 %v1727_v34  ;;  %v1532_v42 = vpack.c.bf16 %v1899_v27, %v1897_v26  ;;  %v299_v60 = vsub.s32 %v296_v52, %v1925_v48  ;;  %p1658_p12 = pnand %p1657_p6, %p2041_p11  ;;  %s1660_s9 = sshll.u32 %s1730_s22, 4  ;;  %s1661_s9 = int_to_ptr.vmem [resolvable:$false] %s1660_s9 }
  0x42   : > { %v396_v25 = vsub.f32 %v1885_v17, %v395_v21  ;;  %v403_v33 = vsub.f32 %v1897_v26, %v402_v30  ;;  %v1541_v44 = vpack.c.bf16 %v395_v21, %v388_v20  ;;  %v800_v14 = vsel %vm798_vm5, %v792_v13, 0  ;;  %s1662_s10 = scalar_lea.vmem %s1661_s9, 2048  ;;  %p1663_p8 = scmp.lt.s32.totalorder %s1980_s14, %s1661_s9 }
  0x43   : > { %v390_v28 = vand.u32 4294901760, %v389_v24  ;;  %v410_v35 = vsub.f32 %v1899_v27, %v409_v31  ;;  %v1544_v45 = vpack.c.bf16 %v409_v31, %v402_v30  ;;  %v803_v15 = vand.u32 4294901760, %v800_v14  ;;  %p1659_p13 = pneg %p1658_p12  ;;  %p1664_p10 = scmp.lt.s32.totalorder %s1662_s10, %s1656_s7 }
  0x44   : > { %v397_v29 = vand.u32 4294901760, %v396_v25  ;;  %v404_v36 = vand.u32 4294901760, %v403_v33  ;;  %1521 = vmatpush3.bf16.msra.mxu1 %v1921_v43 }
  0x45   : > { %v411_v37 = vand.u32 4294901760, %v410_v35  ;;  %1486 = vmatprep.subr.mxu1 %v1729_v39  ;;  %v880_v23 = vsub.f32 %v800_v14, %v803_v15  ;;  %v1250_v35 = vsub.s32 0, %v1925_v48  ;;  %p1665_p0 = por %p1664_p10, %p1663_p8 }
  0x46   : > { %v1523_v32 = vpack.c.bf16 %v397_v29, %v390_v28 }
  0x47   : > { %v1526_v38 = vpack.c.bf16 %v411_v37, %v404_v36  ;;  %v881_v26 = vand.u32 4294901760, %v880_v23  ;;  %p1666_p2 = pnand %p1665_p0, %p1659_p13 }
  0x48   : > { %1524 = vmatpush3.bf16.msra.mxu0 %v1523_v32 }
  0x49   : > { %1525 = vmatprep.subr.bf16.mxu0 %v1727_v34  ;;  %v882_v29 = vsub.f32 %v880_v23, %v881_v26 }
  0x4b   : > { %v883_v32 = vand.u32 4294901760, %v882_v29 }
  0x4c   : > { %1527 = vmatpush3.bf16.msra.mxu0 %v1526_v38 }
  0x4d   : > { %1528 = vmatprep.subr.bf16.mxu0 %v1727_v34 }
  0xc8   : > { %v253_v50 = vpop.xlane.xlu0 %252 }
  0xc9   : > { %v259_v53 = vpop.xlane.xlu1 %258  ;;  %v263_v55 = vmul.f32 0.00390625, %v253_v50 }
  0xca   : > { %v265_v58 = vmul.f32 0.00390625, %v259_v53 }
  0xcb   : > { %v281_v0 = vrot.slane %v263_v55, %v280_v54 }
  0xcc   : > { %v256_v59 = vpop.xlane.xlu0 %255  ;;  %v293_v2 = vrot.slane %v265_v58, %v292_v57 }
  0xcd   : > { %v264_v61 = vmul.f32 0.00390625, %v256_v59  ;;  %v262_v62 = vpop.xlane.xlu1 %261 }
  0xce   : > { %v266_v63 = vmul.f32 0.00390625, %v262_v62 }
  0xcf   : > { %v286_v1 = vrot.slane %v264_v61, %v285_v56 }
  0xd0   : > { %v300_v3 = vrot.slane %v266_v63, %v299_v60 }
  0xd1   : > { %v288_v4 = vsel %vm287_vm1, %v286_v1, %v281_v0 }
  0xd2   : > { %v295_v5 = vsel %vm294_vm2, %v293_v2, %v288_v4 }
  0xd3   : > { %v302_v6 = vsel %vm301_vm3, %v300_v3, %v295_v5 }
  0xd4   : > { %v304_v7 = vsel %vm303_vm4, %v302_v6, 0 }
  0xd5   : > { %v375_v8 = vand.u32 4294901760, %v304_v7 }
  0xd7   : > { %1440 = vmatmul.mubr.f32.vlgmr.msra.gmra.mrb[0].mxu0 %v375_v8  ;;  %v376_v9 = vsub.f32 %v304_v7, %v375_v8 }
  0xd8   : > { %1530 = vmatpush3.bf16.msra.mxu0 %v1529_v40  ;;  %1450 = vmatprep.mubr.msk.f32.mxu0 %vm1728_vm0, %v1729_v39 }
  0xd9   : > { %1531 = vmatprep.subr.bf16.mxu0 %v1727_v34  ;;  %v377_v10 = vand.u32 4294901760, %v376_v9 }
  0xdb   : > { %v378_v11 = vsub.f32 %v376_v9, %v377_v10 }
  0xdc   : > { %1533 = vmatpush3.bf16.msra.mxu0 %v1532_v42 }
  0xdd   : > { %1534 = vmatprep.subr.bf16.mxu0 %v1727_v34  ;;  %v379_v12 = vand.u32 4294901760, %v378_v11 }
  0xdf   : > { %1429 = vmatmul.mubr.f32.vlgmr.msra.gmra.mrb[0].mxu1 %v379_v12  ;;  %1451 = vmatmul.mubr.f32.vlgmr.msra.gmra.mrb[0].mxu0 %v376_v9 }
  0xe0   : > { %1536 = vmatpush3.bf16.msra.mxu0 %v1913_v41  ;;  %1461 = vmatprep.mubr.msk.f32.mxu0 %vm1728_vm0, %v1729_v39 }
  0xe1   : > { %1537 = vmatprep.subr.bf16.mxu0 %v1727_v34  ;;  %1488 = vmatprep.mubr.msk.f32.mxu1 %vm1728_vm0, %v1729_v39 }
  0xe2   : > { %1487 = vmatpush3.msra.mxu1 %v803_v15 }
  0xe3   : > { %1491 = vmatprep.subr.mxu1 %v1729_v39 }
  0xe4   : > { %1539 = vmatpush3.bf16.msra.mxu0 %v1921_v43 }
  0xe5   : > { %1540 = vmatprep.subr.bf16.mxu0 %v1727_v34 }
  0xe7   : > { %1462 = vmatmul.mubr.f32.vlgmr.msra.gmra.mrb[0].mxu0 %v377_v10 }
  0xe8   : > { %1542 = vmatpush3.bf16.msra.mxu0 %v1541_v44  ;;  %1472 = vmatprep.mubr.msk.f32.mxu0 %vm1728_vm0, %v1729_v39 }
  0xe9   : > { %1543 = vmatprep.subr.bf16.mxu0 %v1727_v34 }
  0xec   : > { %1545 = vmatpush3.bf16.msra.mxu0 %v1544_v45 }
  0xed   : > { %1546 = vmatprep.subr.bf16.mxu0 %v1727_v34 }
  0xef   : > { %1473 = vmatmul.mubr.f32.vlgmr.msra.gmra.mrb[0].mxu0 %v375_v8 }
  0xf0   : > { %1548 = vmatpush3.bf16.msra.mxu0 %v1913_v41  ;;  %1483 = vmatprep.mubr.msk.f32.mxu0 %vm1728_vm0, %v1729_v39 }
  0xf1   : > { %1549 = vmatprep.subr.bf16.mxu0 %v1727_v34  ;;  %v793_v34 = vld [vmem:[%s2033_s4] sm:$0x1] }
  0xf4   : > { %1551 = vmatpush3.bf16.msra.mxu0 %v1921_v43 }
  0xf7   : > { %1484 = vmatmul.mubr.f32.vlgmr.msra.gmra.mrb[0].mxu0 %v375_v8 }
 0x1b2   : > { %v381_v16 = vpop.f32.mrb[0].mxu1 }
 0x1b3   : > { %v1430_v17 = vpop.f32.mrb[1].mxu1  ;;  %v382_v19 = vadd.f32 %v381_v16, %v271_v18 }
 0x1ca   : > { %v787_v20 = vpop.f32.mrb[0].mxu0 }
 0x1cb   : > { %v1553_v21 = vadd.f32 %v787_v20, %v382_v19  ;;  %v1485_v22 = vpop.f32.mrb[1].mxu0 }
 0x1cd   : > { %v791_v24 = vmax.f32 %v1553_v21, 0.0 }
 0x1cf   : > { %v796_v25 = vsel %vm794_vm6, %v791_v24, 0 }
 0x1d0   : > { %v868_v27 = vand.u32 4294901760, %v796_v25 }
 0x1d2   : > { %v869_v28 = vsub.f32 %v796_v25, %v868_v27 }
 0x1d4   : > { %v870_v30 = vand.u32 4294901760, %v869_v28 }
 0x1d6   : > { %v871_v31 = vsub.f32 %v869_v28, %v870_v30 }
 0x1d8   : > { %v872_v33 = vand.u32 4294901760, %v871_v31 }
 0x1da   : > { %1489 = vmatmul.mubr.f32.vlgmr.msra.gmra.mrb[2].mxu1 %v872_v33 }
 0x1db   : > { %1492 = vmatpush3.msra.mxu1 %v883_v32  ;;  %1493 = vmatprep.mubr.msk.f32.mxu1 %vm1728_vm0, %v1729_v39 }
 0x1dc   : > { %1496 = vmatprep.subr.mxu1 %v1729_v39 }
 0x1e2   : > { %1494 = vmatmul.mubr.f32.vlgmr.msra.gmra.mrb[2].mxu1 %v868_v27 }
 0x1e3   : > { %1497 = vmatpush3.msra.mxu1 %v880_v23  ;;  %1498 = vmatprep.mubr.msk.f32.mxu1 %vm1728_vm0, %v1729_v39 }
 0x1e4   : > { %1501 = vmatprep.subr.mxu1 %v1729_v39 }
 0x1ea   : > { %1499 = vmatmul.mubr.f32.vlgmr.msra.gmra.mrb[2].mxu1 %v869_v28 }
 0x1eb   : > { %1502 = vmatpush3.msra.mxu1 %v803_v15  ;;  %1503 = vmatprep.mubr.msk.f32.mxu1 %vm1728_vm0, %v1729_v39 }
 0x1ec   : > { %1506 = vmatprep.subr.mxu1 %v1729_v39 }
 0x1f2   : > { %1504 = vmatmul.mubr.f32.vlgmr.msra.gmra.mrb[2].mxu1 %v870_v30 }
 0x1f3   : > { %1507 = vmatpush3.msra.mxu1 %v881_v26  ;;  %1508 = vmatprep.mubr.msk.f32.mxu1 %vm1728_vm0, %v1729_v39 }
 0x1f4   : > { %1511 = vmatprep.subr.mxu1 %v1729_v39 }
 0x1fa   : > { %1509 = vmatmul.mubr.f32.vlgmr.msra.gmra.mrb[2].mxu1 %v868_v27 }
 0x1fb   : > { %1512 = vmatpush3.msra.mxu1 %v803_v15  ;;  %1513 = vmatprep.mubr.msk.f32.mxu1 %vm1728_vm0, %v1729_v39 }
 0x202   : > { %1514 = vmatmul.mubr.f32.vlgmr.msra.gmra.mrb[2].mxu1 %v868_v27 }
 0x2d5   : > { %v1244_v36 = vpop.f32.mrb[2].mxu1 }
 0x2d6   : > { %v1554_v37 = vadd.f32 %v1244_v36, %v793_v34  ;;  %v1515_v38 = vpop.f32.mrb[3].mxu1 }
 0x2d8   : > { %v1251_v40 = vrot.slane %v1554_v37, %v1250_v35 }
 0x2da   : > { %1257 = vbcast.lane.b32.xlu1 %v1251_v40, 264  ;;  %1253 = vbcast.lane.b32.xlu0 %v1251_v40, 256 }
 0x2de   : > { %1261 = vbcast.lane.b32.xlu1 %v1251_v40, 272 }
 0x2e2   : > { %1265 = vbcast.lane.b32.xlu1 %v1251_v40, 280 }
 0x34c   : > { %v1258_v41 = vpop.permute.xlu1 %1257  ;;  %v1254_v42 = vpop.permute.xlu0 %1253 }
 0x34d   : > { %1269 = vst [vmem:[%s242_s12 + $0x10] sm:$0xff] %v1258_v41  ;;  %1270 = vst [vmem:[%s242_s12 + $0x18] sm:$0xff] %v1258_v41 }
 0x34e   : > { %1267 = vst [vmem:[%s242_s12] sm:$0xff] %v1254_v42  ;;  %1268 = vst [vmem:[%s242_s12 + $0x8] sm:$0xff] %v1254_v42 }
 0x350   : > { %v1262_v39 = vpop.permute.xlu1 %1261 }
 0x351   : > { %1271 = vst [vmem:[%s242_s12 + $0x20] sm:$0xff] %v1262_v39  ;;  %1272 = vst [vmem:[%s242_s12 + $0x28] sm:$0xff] %v1262_v39 }
 0x354   : > { %v1266_v43 = vpop.permute.xlu1 %1265 }
 0x355   : > { %1273 = vst [vmem:[%s242_s12 + $0x30] sm:$0xff] %v1266_v43  ;;  %1274 = vst [vmem:[%s242_s12 + $0x38] sm:$0xff] %v1266_v43 }
 0x356   : > { %1669 = shalt.err (!%p1666_p2)
}
 0x357   : > { %s1670_s11 = scalar_lea.hbm %s1985_s8, 1024  ;;  %s1674_s26 = scalar_lea.hbm %s2034_s5, 2048 }
 0x358   : > { %p1671_p4 = scmp.ne.s32.totalorder %s1985_s8, %s1670_s11  ;;  %p1675_p9 = scmp.lt.u32.totalorder %s1985_s8, %s2034_s5 }
 0x359   : > { %p1676_p1 = scmp.lt.u32.totalorder %s1674_s26, %s1670_s11  ;;  %p1678_p6 = scmp.lt.u32.totalorder %s1670_s11, %s1985_s8 }
 0x35a   : > { %p1672_p5 = pnand %p1671_p4, %p2041_p11 }
 0x35b   : > { %p1677_p3 = por %p1676_p1, %p1675_p9 }
 0x35c   : > { %p1673_p7 = pneg %p1672_p5 }
 0x35d   : > { %p1679_p12 = por %p1678_p6, %p1677_p3 }
 0x35f   : > { %p1680_p13 = pnand %p1679_p12, %p1673_p7 }
 0x361   : > { %1683 = shalt.err (!%p1680_p13)
}
 0x362   : > { %s1731_s29 = smov 256   ;;  %s1732_s15 = smov 16  }
 0x363   : > { %1575 = dma.vmem_to_hbm [thread:$0]  (%p2041_p11), %s1980_s14, 1024, %s1985_s8, %s1276_s25, %s1731_s29, %s1731_s29, %s1732_s15  }
 0x364 PF: > { %s1304_s16 = sand.u32 1, %s1710_s18   ;;  %p2042_p8 = scmp.ne.s32.totalorder %s2039_s6, 0 }
 0x365   : > { %p2043_p10 = scmp.ge.s32.totalorder %s1722_s21, 2  ;;  %s1305_s7 = scalar_lea.sflag [#allocation4], %s1304_s16 }
 0x367   : > { %p1582_p0 = pnand %p2043_p10, %p2042_p8 }
 0x369   : > { %1705 = dma.done.wait (!%p1582_p0), %s1305_s7, 1024  }
 0x36a   : > { %1707 = vsyncadd (!%p1582_p0), %s1305_s7, 4294966272  ;;  %p18_p2 = scmp.ge.s32.totalorder %s1788_s24, 4   ;;  %s2044_s18 = smov %s1714_s19 }
 0x36b   : > { %s2045_s19 = smov %s1718_s20  ;;  %s2046_s20 = smov %s1800_s27 }
 0x36c   : > { %s2047_s21 = smov %s1788_s24  ;;  %20 = sbr.rel (!%p18_p2) target bundleno = 5 (0x5), region = 85 }
 0x373   :  { %1310 = vsyncpa [#allocation3], 1 }
 0x374   :  { %1312 = vsyncpa [#allocation3 + $0x1], 1 }
 0x375   :  { %1313 = vsyncpa [#allocation4], 1 }
 0x376   :  { %1315 = vsyncpa [#allocation4 + $0x1], 1 }

</bundles_post_ra>
